<compile_context>
chip_gen: v6e
topology: v6e:2x2x1
jax: 0.10.0
libtpu: 0.0.40
codegen_flags: <defaults>
</compile_context>

<pallas_src>
import functools
import math

import jax
import jax.numpy as jnp
from jax.experimental import pallas as pl
from jax.experimental.pallas import tpu as pltpu


def _rel_pos_window_kernel(pad_ref, freq_ref, phase_ref, out_ref, *, W, w, TL):
    # pad_ref  : (1, Lp + 2w, 1) f32 — zero-padded positions for this batch, on the sublane axis
    # freq_ref : (1, 1, H)       f32 — inv_freq duplicated pairwise: [f0, f0, f1, f1, ...]
    # phase_ref: (1, 1, H)       f32 — [0, pi/2, 0, pi/2, ...]   (cos(x) = sin(x + pi/2))
    # out_ref  : (1, W, TL, H)   x.dtype
    t = pl.program_id(1)
    base = t * TL
    if TL % 8 == 0:
        base = pl.multiple_of(base, 8)

    q = pad_ref[0, pl.ds(base + w, TL), :]        # (TL, 1) query positions (f32)
    freq = freq_ref[0]                            # (1, H)
    phase = phase_ref[0]                          # (1, H)

    for k in range(W):                            # statically unrolled over window offsets
        shifted = pad_ref[0, pl.ds(base + k, TL), :]       # (TL, 1) shifted (windowed) positions
        relpos = shifted - q                               # (TL, 1) f32
        ang = relpos * freq + phase                        # (TL, H) f32, broadcast over H
        out_ref[0, k, :, :] = jnp.sin(ang).astype(out_ref.dtype)


def rel_positional_window_embedding(pos, x, embedding_size, window=21, block_l=None):
    """JAX/Pallas equivalent of RelPositionalWindowEmbedding.forward(pos, x)."""
    assert window % 2 == 1, "Window size should be an odd integer."
    assert embedding_size % 2 == 0, "embedding_size must be even."
    B, L = pos.shape
    H = embedding_size
    w = (window - 1) // 2
    W = 2 * w + 1
    out_dtype = x.dtype
    item = jnp.dtype(out_dtype).itemsize

    # --- choose the L tile: biggest block (<= ~8 MiB) so 2x-buffered output fits all generations ---
    if block_l is None:
        budget = 8 * 1024 * 1024
        tl = max(8, budget // max(1, W * H * item))
        tl = (tl // 128) * 128 if tl >= 128 else (tl // 8) * 8
        block_l = int(min(512, max(8, tl)))
    if L <= block_l:
        TL, num_t = L, 1
    else:
        assert block_l % 8 == 0, "block_l must be a multiple of 8 when tiling L."
        TL, num_t = block_l, pl.cdiv(L, block_l)
    Lp = num_t * TL

    # --- host glue: zero-pad positions (w left, w + tail-pad right); keep f32 for in-kernel math ---
    pos32 = pos.astype(jnp.float32)
    pos_pad = jnp.pad(pos32, ((0, 0), (w, w + (Lp - L)))).reshape(B, Lp + 2 * w, 1)

    # inv_freq = 1 / 10000 ** (arange(0, H, 2) / H), duplicated pairwise; phase turns odd lanes into cos
    inv_freq = 1.0 / (10000.0 ** (jnp.arange(0.0, H, 2.0, dtype=jnp.float32) / H))
    freq2 = jnp.repeat(inv_freq, 2).reshape(1, 1, H)
    phase = jnp.tile(jnp.array([0.0, math.pi / 2.0], jnp.float32), H // 2).reshape(1, 1, H)

    # --- VMEM limit: double-buffered output block + (lane-padded) position strip + headroom ---
    out_block_bytes = W * TL * H * item
    pad_block_bytes = (Lp + 2 * w) * 128 * 4
    vmem_limit = 2 * out_block_bytes + 2 * pad_block_bytes + 4 * 128 * 8 * 4 + (2 << 20)
    vmem_limit = int(min(60 * 2**20, max(vmem_limit, 32 * 2**20)))

    cost = pl.CostEstimate(
        flops=3 * B * W * Lp * H,
        transcendentals=B * W * Lp * H,
        bytes_accessed=B * W * Lp * H * item + B * (Lp + 2 * w) * 4 + 2 * H * 4,
    )

    kernel = functools.partial(_rel_pos_window_kernel, W=W, w=w, TL=TL)

    out = pl.pallas_call(
        kernel,
        out_shape=jax.ShapeDtypeStruct((B, W, Lp, H), out_dtype),
        grid_spec=pltpu.PrefetchScalarGridSpec(
            num_scalar_prefetch=0,
            grid=(B, num_t),
            in_specs=[
                pl.BlockSpec((1, Lp + 2 * w, 1), lambda b, t: (b, 0, 0)),   # padded positions
                pl.BlockSpec((1, 1, H), lambda b, t: (0, 0, 0)),            # freq (pairwise dup)
                pl.BlockSpec((1, 1, H), lambda b, t: (0, 0, 0)),            # phase [0, pi/2, ...]
            ],
            out_specs=pl.BlockSpec((1, W, TL, H), lambda b, t: (b, 0, t, 0)),
        ),
        compiler_params=pltpu.CompilerParams(
            dimension_semantics=("parallel", "parallel"),
            vmem_limit_bytes=vmem_limit,
        ),
        cost_estimate=cost,
    )(pos_pad, freq2, phase)

    if Lp != L:
        out = out[:, :, :L, :]
    return out


def _reference(pos, x, embedding_size, window):
    # pure-JAX reference matching the PyTorch forward exactly
    B, L = pos.shape
    H = embedding_size
    w = (window - 1) // 2
    W = 2 * w + 1
    dtype = x.dtype
    inv_freq = (1.0 / (10000.0 ** (jnp.arange(0.0, H, 2.0, dtype=jnp.float32) / H))).astype(dtype)
    padded = jnp.pad(pos.astype(dtype), ((0, 0), (w, w)))
    idx = jnp.arange(W)[:, None] + jnp.arange(L)[None, :]
    relpos = padded[:, idx] - pos.astype(dtype)[:, None, :]             # [B, W, L]
    sinu = relpos[..., None] * inv_freq                                 # [B, W, L, H/2]
    return jnp.stack([jnp.sin(sinu), jnp.cos(sinu)], axis=-1).reshape(B, W, L, H)


if __name__ == "__main__":
    key = jax.random.PRNGKey(0)
    k_pos, k_x = jax.random.split(key)

    # Primary check: single L-tile path, module-consistent toy sizes.
    B, L, H = 2, 8, 32
    window = 5  # W = 5
    pos = jax.random.randint(k_pos, (B, L), 0, 64).astype(jnp.float32)  # column-wise positions [B, L]
    x = jax.random.normal(k_x, (B, L, 4, H), dtype=jnp.float32)          # only dtype is used

    embed = rel_positional_window_embedding(pos, x, embedding_size=H, window=window)
    embed = jax.block_until_ready(embed)
    ref = _reference(pos, x, H, window)
    assert embed.shape == (B, window, L, H), embed.shape
    assert embed.dtype == x.dtype
    assert jnp.allclose(embed, ref, atol=1e-5, rtol=1e-5), "mismatch vs reference (single tile)"

    # Secondary check: exercises the tiled-L path (multiple tiles + ragged tail slice).
    B2, L2, H2, window2 = 2, 20, 32, 5
    pos2 = jax.random.randint(jax.random.PRNGKey(1), (B2, L2), 0, 64).astype(jnp.float32)
    x2 = jax.random.normal(jax.random.PRNGKey(2), (B2, L2, 1, H2), dtype=jnp.float32)
    embed2 = jax.block_until_ready(
        rel_positional_window_embedding(pos2, x2, embedding_size=H2, window=window2, block_l=16))
    ref2 = _reference(pos2, x2, H2, window2)
    assert embed2.shape == (B2, window2, L2, H2), embed2.shape
    assert jnp.allclose(embed2, ref2, atol=1e-5, rtol=1e-5), "mismatch vs reference (tiled)"

    print("KERNEL_OK")
</pallas_src>

<mosaic_0001>
module attributes {stable_mosaic.version = 11 : i64} {
  func.func @_rel_pos_window_kernel(%arg0: i32, %arg1: i32, %arg2: memref<1x12x1xf32, #tpu.memory_space<vmem>>, %arg3: memref<1x1x32xf32, #tpu.memory_space<vmem>>, %arg4: memref<1x1x32xf32, #tpu.memory_space<vmem>>, %arg5: memref<1x5x8x32xf32, #tpu.memory_space<vmem>>) attributes {dimension_semantics = [#tpu.dimension_semantics<parallel>, #tpu.dimension_semantics<parallel>], iteration_bounds = array<i64: 2, 1>, scalar_prefetch = 0 : i64, scratch_operands = 0 : i64, tpu.core_type = #tpu.core_type<tc>, window_params = [{transform_indices = @transform_0, window_bounds = array<i64: 1, 12, 1>}, {pipeline_mode = #tpu.pipeline_mode<synchronous>, transform_indices = @transform_1, window_bounds = array<i64: 1, 1, 32>}, {pipeline_mode = #tpu.pipeline_mode<synchronous>, transform_indices = @transform_2, window_bounds = array<i64: 1, 1, 32>}, {transform_indices = @transform_3, window_bounds = array<i64: 1, 5, 8, 32>}]} {
    %c8_i32 = arith.constant 8 : i32
    %0 = arith.muli %arg1, %c8_i32 : i32
    %1 = tpu.assume_multiple %0, 8 : i32
    %c2_i32 = arith.constant 2 : i32
    %2 = arith.addi %1, %c2_i32 : i32
    %c0 = arith.constant 0 : index
    %3 = arith.index_cast %2 : i32 to index
    %c0_0 = arith.constant 0 : index
    %4 = vector.load %arg2[%c0, %3, %c0_0] : memref<1x12x1xf32, #tpu.memory_space<vmem>>, vector<1x8x1xf32>
    %5 = vector.shape_cast %4 : vector<1x8x1xf32> to vector<8x1xf32>
    %c0_1 = arith.constant 0 : index
    %c0_2 = arith.constant 0 : index
    %c0_3 = arith.constant 0 : index
    %6 = vector.load %arg3[%c0_1, %c0_2, %c0_3] : memref<1x1x32xf32, #tpu.memory_space<vmem>>, vector<1x1x32xf32>
    %7 = vector.shape_cast %6 : vector<1x1x32xf32> to vector<1x32xf32>
    %c0_4 = arith.constant 0 : index
    %c0_5 = arith.constant 0 : index
    %c0_6 = arith.constant 0 : index
    %8 = vector.load %arg4[%c0_4, %c0_5, %c0_6] : memref<1x1x32xf32, #tpu.memory_space<vmem>>, vector<1x1x32xf32>
    %9 = vector.shape_cast %8 : vector<1x1x32xf32> to vector<1x32xf32>
    %c0_i32 = arith.constant 0 : i32
    %10 = arith.addi %1, %c0_i32 : i32
    %c0_7 = arith.constant 0 : index
    %11 = arith.index_cast %10 : i32 to index
    %c0_8 = arith.constant 0 : index
    %12 = vector.load %arg2[%c0_7, %11, %c0_8] : memref<1x12x1xf32, #tpu.memory_space<vmem>>, vector<1x8x1xf32>
    %13 = vector.shape_cast %12 : vector<1x8x1xf32> to vector<8x1xf32>
    %14 = arith.subf %13, %5 : vector<8x1xf32>
    %15 = vector.broadcast %14 : vector<8x1xf32> to vector<8x32xf32>
    %16 = vector.broadcast %7 : vector<1x32xf32> to vector<8x32xf32>
    %17 = arith.mulf %15, %16 : vector<8x32xf32>
    %18 = vector.broadcast %9 : vector<1x32xf32> to vector<8x32xf32>
    %19 = arith.addf %17, %18 : vector<8x32xf32>
    %20 = math.sin %19 : vector<8x32xf32>
    %c0_9 = arith.constant 0 : index
    %c0_10 = arith.constant 0 : index
    %c0_11 = arith.constant 0 : index
    %c0_12 = arith.constant 0 : index
    %21 = vector.load %arg5[%c0_9, %c0_10, %c0_11, %c0_12] : memref<1x5x8x32xf32, #tpu.memory_space<vmem>>, vector<1x1x8x32xf32>
    %22 = vector.shape_cast %21 : vector<1x1x8x32xf32> to vector<8x32xf32>
    %23 = vector.shape_cast %20 : vector<8x32xf32> to vector<1x1x8x32xf32>
    tpu.vector_store %arg5[%c0_9, %c0_10, %c0_11, %c0_12], %23 {strides = array<i32>} : memref<1x5x8x32xf32, #tpu.memory_space<vmem>>, vector<1x1x8x32xf32>,
    %c1_i32 = arith.constant 1 : i32
    %24 = arith.addi %1, %c1_i32 : i32
    %c0_13 = arith.constant 0 : index
    %25 = arith.index_cast %24 : i32 to index
    %c0_14 = arith.constant 0 : index
    %26 = vector.load %arg2[%c0_13, %25, %c0_14] : memref<1x12x1xf32, #tpu.memory_space<vmem>>, vector<1x8x1xf32>
    %27 = vector.shape_cast %26 : vector<1x8x1xf32> to vector<8x1xf32>
    %28 = arith.subf %27, %5 : vector<8x1xf32>
    %29 = vector.broadcast %28 : vector<8x1xf32> to vector<8x32xf32>
    %30 = vector.broadcast %7 : vector<1x32xf32> to vector<8x32xf32>
    %31 = arith.mulf %29, %30 : vector<8x32xf32>
    %32 = vector.broadcast %9 : vector<1x32xf32> to vector<8x32xf32>
    %33 = arith.addf %31, %32 : vector<8x32xf32>
    %34 = math.sin %33 : vector<8x32xf32>
    %c0_15 = arith.constant 0 : index
    %c1 = arith.constant 1 : index
    %c0_16 = arith.constant 0 : index
    %c0_17 = arith.constant 0 : index
    %35 = vector.load %arg5[%c0_15, %c1, %c0_16, %c0_17] : memref<1x5x8x32xf32, #tpu.memory_space<vmem>>, vector<1x1x8x32xf32>
    %36 = vector.shape_cast %35 : vector<1x1x8x32xf32> to vector<8x32xf32>
    %37 = vector.shape_cast %34 : vector<8x32xf32> to vector<1x1x8x32xf32>
    tpu.vector_store %arg5[%c0_15, %c1, %c0_16, %c0_17], %37 {strides = array<i32>} : memref<1x5x8x32xf32, #tpu.memory_space<vmem>>, vector<1x1x8x32xf32>,
    %c2_i32_18 = arith.constant 2 : i32
    %38 = arith.addi %1, %c2_i32_18 : i32
    %c0_19 = arith.constant 0 : index
    %39 = arith.index_cast %38 : i32 to index
    %c0_20 = arith.constant 0 : index
    %40 = vector.load %arg2[%c0_19, %39, %c0_20] : memref<1x12x1xf32, #tpu.memory_space<vmem>>, vector<1x8x1xf32>
    %41 = vector.shape_cast %40 : vector<1x8x1xf32> to vector<8x1xf32>
    %42 = arith.subf %41, %5 : vector<8x1xf32>
    %43 = vector.broadcast %42 : vector<8x1xf32> to vector<8x32xf32>
    %44 = vector.broadcast %7 : vector<1x32xf32> to vector<8x32xf32>
    %45 = arith.mulf %43, %44 : vector<8x32xf32>
    %46 = vector.broadcast %9 : vector<1x32xf32> to vector<8x32xf32>
    %47 = arith.addf %45, %46 : vector<8x32xf32>
    %48 = math.sin %47 : vector<8x32xf32>
    %c0_21 = arith.constant 0 : index
    %c2 = arith.constant 2 : index
    %c0_22 = arith.constant 0 : index
    %c0_23 = arith.constant 0 : index
    %49 = vector.load %arg5[%c0_21, %c2, %c0_22, %c0_23] : memref<1x5x8x32xf32, #tpu.memory_space<vmem>>, vector<1x1x8x32xf32>
    %50 = vector.shape_cast %49 : vector<1x1x8x32xf32> to vector<8x32xf32>
    %51 = vector.shape_cast %48 : vector<8x32xf32> to vector<1x1x8x32xf32>
    tpu.vector_store %arg5[%c0_21, %c2, %c0_22, %c0_23], %51 {strides = array<i32>} : memref<1x5x8x32xf32, #tpu.memory_space<vmem>>, vector<1x1x8x32xf32>,
    %c3_i32 = arith.constant 3 : i32
    %52 = arith.addi %1, %c3_i32 : i32
    %c0_24 = arith.constant 0 : index
    %53 = arith.index_cast %52 : i32 to index
    %c0_25 = arith.constant 0 : index
    %54 = vector.load %arg2[%c0_24, %53, %c0_25] : memref<1x12x1xf32, #tpu.memory_space<vmem>>, vector<1x8x1xf32>
    %55 = vector.shape_cast %54 : vector<1x8x1xf32> to vector<8x1xf32>
    %56 = arith.subf %55, %5 : vector<8x1xf32>
    %57 = vector.broadcast %56 : vector<8x1xf32> to vector<8x32xf32>
    %58 = vector.broadcast %7 : vector<1x32xf32> to vector<8x32xf32>
    %59 = arith.mulf %57, %58 : vector<8x32xf32>
    %60 = vector.broadcast %9 : vector<1x32xf32> to vector<8x32xf32>
    %61 = arith.addf %59, %60 : vector<8x32xf32>
    %62 = math.sin %61 : vector<8x32xf32>
    %c0_26 = arith.constant 0 : index
    %c3 = arith.constant 3 : index
    %c0_27 = arith.constant 0 : index
    %c0_28 = arith.constant 0 : index
    %63 = vector.load %arg5[%c0_26, %c3, %c0_27, %c0_28] : memref<1x5x8x32xf32, #tpu.memory_space<vmem>>, vector<1x1x8x32xf32>
    %64 = vector.shape_cast %63 : vector<1x1x8x32xf32> to vector<8x32xf32>
    %65 = vector.shape_cast %62 : vector<8x32xf32> to vector<1x1x8x32xf32>
    tpu.vector_store %arg5[%c0_26, %c3, %c0_27, %c0_28], %65 {strides = array<i32>} : memref<1x5x8x32xf32, #tpu.memory_space<vmem>>, vector<1x1x8x32xf32>,
    %c4_i32 = arith.constant 4 : i32
    %66 = arith.addi %1, %c4_i32 : i32
    %c0_29 = arith.constant 0 : index
    %67 = arith.index_cast %66 : i32 to index
    %c0_30 = arith.constant 0 : index
    %68 = vector.load %arg2[%c0_29, %67, %c0_30] : memref<1x12x1xf32, #tpu.memory_space<vmem>>, vector<1x8x1xf32>
    %69 = vector.shape_cast %68 : vector<1x8x1xf32> to vector<8x1xf32>
    %70 = arith.subf %69, %5 : vector<8x1xf32>
    %71 = vector.broadcast %70 : vector<8x1xf32> to vector<8x32xf32>
    %72 = vector.broadcast %7 : vector<1x32xf32> to vector<8x32xf32>
    %73 = arith.mulf %71, %72 : vector<8x32xf32>
    %74 = vector.broadcast %9 : vector<1x32xf32> to vector<8x32xf32>
    %75 = arith.addf %73, %74 : vector<8x32xf32>
    %76 = math.sin %75 : vector<8x32xf32>
    %c0_31 = arith.constant 0 : index
    %c4 = arith.constant 4 : index
    %c0_32 = arith.constant 0 : index
    %c0_33 = arith.constant 0 : index
    %77 = vector.load %arg5[%c0_31, %c4, %c0_32, %c0_33] : memref<1x5x8x32xf32, #tpu.memory_space<vmem>>, vector<1x1x8x32xf32>
    %78 = vector.shape_cast %77 : vector<1x1x8x32xf32> to vector<8x32xf32>
    %79 = vector.shape_cast %76 : vector<8x32xf32> to vector<1x1x8x32xf32>
    tpu.vector_store %arg5[%c0_31, %c4, %c0_32, %c0_33], %79 {strides = array<i32>} : memref<1x5x8x32xf32, #tpu.memory_space<vmem>>, vector<1x1x8x32xf32>,
    return
  }
  func.func @transform_0(%arg0: i32, %arg1: i32) -> (i32, i32, i32) {
    %c0_i32 = arith.constant 0 : i32
    %c0_i32_0 = arith.constant 0 : i32
    %c0_i32_1 = arith.constant 0 : i32
    return %arg0, %c0_i32, %c0_i32_0 : i32, i32, i32
  }
  func.func @transform_1(%arg0: i32, %arg1: i32) -> (i32, i32, i32) {
    %c0_i32 = arith.constant 0 : i32
    %c0_i32_0 = arith.constant 0 : i32
    %c0_i32_1 = arith.constant 0 : i32
    %c0_i32_2 = arith.constant 0 : i32
    return %c0_i32, %c0_i32_0, %c0_i32_1 : i32, i32, i32
  }
  func.func @transform_2(%arg0: i32, %arg1: i32) -> (i32, i32, i32) {
    %c0_i32 = arith.constant 0 : i32
    %c0_i32_0 = arith.constant 0 : i32
    %c0_i32_1 = arith.constant 0 : i32
    %c0_i32_2 = arith.constant 0 : i32
    return %c0_i32, %c0_i32_0, %c0_i32_1 : i32, i32, i32
  }
  func.func @transform_3(%arg0: i32, %arg1: i32) -> (i32, i32, i32, i32) {
    %c0_i32 = arith.constant 0 : i32
    %c0_i32_0 = arith.constant 0 : i32
    %c0_i32_1 = arith.constant 0 : i32
    return %arg0, %c0_i32, %arg1, %c0_i32_0 : i32, i32, i32, i32
  }
}

</mosaic_0001>

<bundles_post_ra>
// kernel: tpu_custom_call.1
= control target key start
LH: loop header
LB: loop body
LE: loop exit
PB: predicated region body
PF: predicated region fallthrough
CT: control target
= control target key end

     0   :  { %8 = vsyncpa [#allocation3], 0  ;;  %s1642_s0 = inlined_call_operand.vmem [shape: f32[2,12,1], index: 0, kind: input, shape index: {}]   ;;  %s1643_s1 = inlined_call_operand.vmem [shape: f32[1,1,32], index: 1, kind: input, shape index: {}]   ;;  %s1644_s2 = inlined_call_operand.vmem [shape: f32[1,1,32], index: 2, kind: input, shape index: {}]   ;;  %s1645_s3 = inlined_call_operand.hbm [shape: f32[2,5,8,32], index: 3, kind: output, shape index: {}]  }
   0x1   :  { %10 = vsyncpa [#allocation3 + $0x1], 0  ;;  %s1142_s12 = smov 0   ;;  %s1144_s13 = smov 0  }
   0x2   :  { %s1146_s14 = smov 0   ;;  %s1148_s15 = smov 0  }
   0x3   :  { %s1150_s16 = smov 0   ;;  %s1152_s17 = smov 0  }
   0x4 LB: > { %s884_s18 = sadd.s32 4294967295, %s1110_s17   ;;  %s885_s19 = sadd.s32 4294967294, %s1110_s17   ;;  %s1110_s17 = sphi %s1152_s17, %s16_s17   ;;  %s1106_s16 = sphi %s1150_s16, %s1658_s16   ;;  %s1102_s15 = sphi %s1148_s15, %s1657_s15   ;;  %s1098_s14 = sphi %s1146_s14, %s1656_s14   ;;  %s1094_s13 = sphi %s1144_s13, %s1655_s13   ;;  %s1090_s12 = sphi %s1142_s12, %s1654_s12  }
   0x5   : > { %s28_s20 = sadd.s32 1, %s1106_s16  ;;  %s105_s21 = sadd.s32 1, %s1098_s14 }
   0x6   : > { %p30_p0 = scmp.ge.s32.totalorder %s28_s20, 2  ;;  %p115_p1 = scmp.ne.s32.totalorder %s1098_s14, %s1094_s13 }
   0x7   : > { %p116_p2 = scmp.eq.s32.totalorder %s884_s18, 1  ;;  %p121_p3 = scmp.ne.s32.totalorder %s1094_s13, %s1090_s12 }
   0x8   : > { %s1660_s20 = smov (%p30_p0, %s28_s20), 0  ;;  %p122_p5 = scmp.eq.s32.totalorder %s885_s19, 1 }
   0x9   : > { %p1182_p4 = por %p116_p2, %p115_p1  ;;  %s100_s23 = ssub.s32 %s1106_s16, %s1660_s20 }
   0xa   : > { %p888_p6 = scmp.ge.s32.totalorder %s1110_s17, 1  ;;  %p103_p7 = scmp.eq.s32.totalorder %s100_s23, 0 }
   0xb   : > { %p1189_p8 = por %p122_p5, %p121_p3  ;;  %p154_p9 = scmp.lt.s32.totalorder %s1110_s17, 3 }
   0xc   : > { %s1195_s25 = scalar_select %p103_p7, %s1098_s14, %s105_s21  }
   0xd   : > { %p155_p10 = pnand %p888_p6, %p154_p9 }
   0xe   : > { %p178_p11 = scmp.lt.s32.totalorder (!%p155_p10), %s1102_s15, 1  ;;  %s175_s8 = sand.u32 (!%p155_p10), 1, %s1094_s13  }
   0xf   : > { %158 = sbr.rel (%p155_p10) target bundleno = 332 (0x14c), region = 32 }
  0x10   : > { %s926_s9 = smul.u32 (!%p155_p10), 40, %s175_s8 }
  0x11   : > { %s947_s11 = smul.u32 (!%p155_p10), 640, %s1102_s15 }
  0x12   : > { %s1491_s10 = scalar_lea.vmem (!%p155_p10), [#allocation2], %s926_s9 }
  0x13   : > { %s798_s18 = sshll.u32 (!%p155_p10), %s1491_s10, 4  ;;  %s1588_s23 = scalar_lea.hbm (!%p155_p10), %s1645_s3, %s947_s11  ;;  %s1590_s18 = int_to_ptr.vmem [resolvable:$true] %s798_s18 }
  0x14   : > { %v1112_v0 = vmov 0   ;;  %s179_s26 = scalar_select %p178_p11, %s1102_s15, 1  ;;  %v1205_v11 = vld [vmem:[%s1643_s1] ss:$0 sm:$0xff]  ;;  %v1113_v49 = vmov 683565275  }
  0x15   : > { %1013 = vset.pattern.permute.xlu1 %v1112_v0  ;;  %1012 = vset.pattern.permute.xlu0 %v1112_v0  ;;  %v1210_v12 = vld [vmem:[%s1644_s2] ss:$0 sm:$0xff]  ;;  %v1114_v51 = vmov 2475754826   ;;  %v1115_v53 = vmov 2131351028  }
  0x16   : > { %s925_s27 = sshll.u32 %s179_s26, 4  ;;  %v1116_v55 = vmov 2102212464   ;;  %v1117_v57 = vmov 920167782   ;;  %s1597_s15 = scalar_lea.sflag [#allocation3], %s175_s8 }
  0x17   : > { %s182_s30 = scalar_lea.vmem %s1642_s0, %s925_s27  ;;  %s1034_s26 = scalar_lea.vmem %s1590_s18, 640 }
  0x18   : > { %v891_v1 = vld [vmem:[%s182_s30 + $0x2] sm:$0xff]  ;;  %p1035_p12 = scmp.ne.s32.totalorder %s1590_s18, %s1034_s26  ;;  %s1119_s27 = smov [#allocation2]  }
  0x19   : > { %v190_v2 = vld [vmem:[%s182_s30] sm:$0xff]  ;;  %v435_v4 = vsub.f32 %v891_v1, %v891_v1  ;;  %s1038_s28 = sshll.u32 %s1119_s27, 4  ;;  %s1039_s28 = int_to_ptr.vmem [resolvable:$false] %s1038_s28 }
  0x1a   : > { %v910_v3 = vld [vmem:[%s182_s30 + $0x3] sm:$0xff]  ;;  %v191_v5 = vsub.f32 %v190_v2, %v891_v1  ;;  %v1118_v2 = vmov 1326507024   ;;  %p1036_p13 = pnand %p1035_p12, %p1182_p4  ;;  %s1040_s29 = scalar_lea.vmem %s1039_s28, 1280 }
  0x1b   : > { %v898_v6 = vld [vmem:[%s182_s30 + $0x1] sm:$0xff]  ;;  %438 = vperm.xlu1 %1013, %v435_v4   ;;  %v552_v7 = vsub.f32 %v910_v3, %v891_v1  ;;  %p1041_p1 = scmp.lt.s32.totalorder %s1590_s18, %s1039_s28  ;;  %p1042_p2 = scmp.lt.s32.totalorder %s1040_s29, %s1034_s26 }
  0x1c   : > { %194 = vperm.xlu0 %1012, %v191_v5   ;;  %v320_v8 = vsub.f32 %v898_v6, %v891_v1  ;;  %v916_v9 = vld [vmem:[%s182_s30 + $0x4] sm:$0xff]  ;;  %p1037_p0 = pneg %p1036_p13 }
  0x1d   : > { %v669_v10 = vsub.f32 %v916_v9, %v891_v1  ;;  %p1043_p3 = por %p1042_p2, %p1041_p1 }
  0x1f   : > { %555 = vperm.xlu1 %1013, %v552_v7   ;;  %p1044_p5 = pnand %p1043_p3, %p1037_p0 }
  0x20   : > { %323 = vperm.xlu0 %1012, %v320_v8  }
  0x24   : > { %672 = vperm.xlu0 %1012, %v669_v10  }
  0x96   : > { %v439_v13 = vpop.permute.xlu1 %438 }
  0x97   : > { %v195_v14 = vpop.permute.xlu0 %194  ;;  %v441_v15 = vmul.f32 %v1205_v11, %v439_v13 }
  0x98   : > { %v203_v16 = vmul.f32 %v1205_v11, %v195_v14 }
  0x99   : > { %v1215_v17 = vadd.f32 %v1210_v12, %v441_v15 }
  0x9a   : > { %v1218_v18 = vadd.f32 %v1210_v12, %v203_v16  ;;  %v556_v19 = vpop.permute.xlu1 %555 }
  0x9b   : > { %v443_v20 = vand.u32 2147483647, %v1215_v17  ;;  %v446_v21 = vand.u32 2139095040, %v1215_v17  ;;  %v558_v26 = vmul.f32 %v1205_v11, %v556_v19  ;;  %v324_v37 = vpop.permute.xlu0 %323  ;;  %vm445_vm13 = vcmp.lt.s32.totalorder %v1215_v17, 0 }
  0x9c   : > { %v211_v22 = vand.u32 2147483647, %v1218_v18  ;;  %v214_v23 = vand.u32 2139095040, %v1218_v18  ;;  %v1236_v43 = vmul.f32 %v1205_v11, %v324_v37  ;;  %vm213_vm14 = vcmp.lt.s32.totalorder %v1218_v18, 0 }
  0x9d   : > { %v447_v24 = vshrl.u32 %v446_v21, 23  ;;  %v450_v25 = vand.u32 8388607, %v443_v20  ;;  %v1230_v30 = vadd.f32 %v1210_v12, %v558_v26  ;;  %vm1357_vm15 = vcmp.le.f32.partialorder %v443_v20, 0.7853982 }
  0x9e   : > { %v215_v27 = vshrl.u32 %v214_v23, 23  ;;  %v218_v28 = vand.u32 8388607, %v211_v22 }
  0x9f   : > { %v905_v29 = vadd.s32 4294967169, %v447_v24  ;;  %v451_v32 = vor.u32 8388608, %v450_v25  ;;  %v563_v36 = vand.u32 2139095040, %v1230_v30  ;;  %v560_v47 = vand.u32 2147483647, %v1230_v30 }
  0xa0   : > { %v894_v31 = vadd.s32 4294967169, %v215_v27  ;;  %v219_v34 = vor.u32 8388608, %v218_v28 }
  0xa1   : > { %v453_v33 = vadd.s32 1, %v905_v29  ;;  %v564_v39 = vshrl.u32 %v563_v36, 23  ;;  %v1233_v41 = vshll.u32 %v451_v32, 8 }
  0xa2   : > { %v221_v35 = vadd.s32 1, %v894_v31  ;;  %v1240_v46 = vshll.u32 %v219_v34, 8 }
  0xa3   : > { %vm454_vm0 = vcmp.gt.s32.totalorder %v453_v33, 0  ;;  %v1250_v60 = vadd.s32 4294967169, %v564_v39 }
  0xa4   : > { %v455_v38 = vsel %vm454_vm0, %v453_v33, 0  ;;  %vm222_vm1 = vcmp.gt.s32.totalorder %v221_v35, 0 }
  0xa5   : > { %v457_v40 = vand.u32 31, %v455_v38  ;;  %v223_v42 = vsel %vm222_vm1, %v221_v35, 0  ;;  %v456_v44 = vshrl.u32 %v455_v38, 5 }
  0xa6   : > { %v1238_v45 = vand.u32 31, %v223_v42  ;;  %v1248_v59 = vshrl.u32 %v223_v42, 5 }
  0xa7   : > { %v458_v48 = vsub.s32 32, %v457_v40  ;;  %v460_v50 = vshll.u32 %v1113_v49, %v457_v40  ;;  %v463_v52 = vshll.u32 %v1114_v51, %v457_v40  ;;  %v466_v54 = vshll.u32 %v1115_v53, %v457_v40 }
  0xa8   : > { %v469_v56 = vshll.u32 %v1116_v55, %v457_v40  ;;  %v472_v58 = vshll.u32 %v1117_v57, %v457_v40  ;;  %vm475_vm2 = vcmp.lt.s32.totalorder %v456_v44, 1  ;;  %vm476_vm3 = vcmp.lt.s32.totalorder %v456_v44, 2 }
  0xa9   : > { %v459_v61 = vshrl.u32 %v1113_v49, %v458_v48  ;;  %v461_v62 = vshrl.u32 %v1114_v51, %v458_v48  ;;  %v464_v63 = vshrl.u32 %v1115_v53, %v458_v48  ;;  %v467_v0 = vshrl.u32 %v1116_v55, %v458_v48 }
  0xaa   : > { %v470_v1 = vshrl.u32 %v1117_v57, %v458_v48  ;;  %v473_v3 = vshrl.u32 %v1118_v2, %v458_v48  ;;  %v226_v7 = vsub.s32 32, %v1238_v45  ;;  %vm477_vm4 = vcmp.lt.s32.totalorder %v456_v44, 3 }
  0xab   : > { %v462_v4 = vor.u32 %v461_v62, %v460_v50  ;;  %v465_v5 = vor.u32 %v464_v63, %v463_v52  ;;  %v468_v6 = vor.u32 %v467_v0, %v466_v54  ;;  %vm478_vm5 = vcmp.lt.s32.totalorder %v456_v44, 4 }
  0xac   : > { %v471_v8 = vor.u32 %v470_v1, %v469_v56  ;;  %v474_v9 = vor.u32 %v473_v3, %v472_v58  ;;  %v228_v23 = vshll.u32 %v1113_v49, %v1238_v45  ;;  %v229_v26 = vshrl.u32 %v1114_v51, %v226_v7 }
  0xad   : > { %v479_v10 = vsel %vm475_vm2, %v459_v61, %v462_v4  ;;  %v480_v13 = vsel %vm478_vm5, %v468_v6, 2102212464  ;;  %v483_v14 = vsel %vm475_vm2, %v462_v4, %v465_v5  ;;  %v487_v15 = vsel %vm475_vm2, %v465_v5, %v468_v6 }
  0xae   : > { %v481_v16 = vsel %vm477_vm4, %v465_v5, %v480_v13  ;;  %v484_v19 = vsel %vm478_vm5, %v471_v8, 920167782  ;;  %v488_v21 = vsel %vm478_vm5, %v474_v9, 1326507024  ;;  %v231_v27 = vshll.u32 %v1114_v51, %v1238_v45 }
  0xaf   : > { %v485_v24 = vsel %vm477_vm4, %v468_v6, %v484_v19  ;;  %v489_v25 = vsel %vm477_vm4, %v471_v8, %v488_v21  ;;  %v482_v28 = vsel %vm476_vm3, %v479_v10, %v481_v16  ;;  %v232_v32 = vshrl.u32 %v1115_v53, %v226_v7 }
  0xb0   : > { %v486_v29 = vsel %vm476_vm3, %v483_v14, %v485_v24  ;;  %v490_v31 = vsel %vm476_vm3, %v487_v15, %v489_v25  ;;  %v230_v37 = vor.u32 %v229_v26, %v228_v23  ;;  %v234_v39 = vshll.u32 %v1115_v53, %v1238_v45 }
  0xb1   : > { %v1269_v33 = vmul.u32.u64.low %v1233_v41, %v490_v31  ;;  %v1270_v34 = vmul.u32.u64.high %v1233_v41, %v490_v31, %v1269_v33  ;;  %v1273_v35 = vmul.u32.u64.low %v1233_v41, %v486_v29  ;;  %v1274_v36 = vmul.u32.u64.high %v1233_v41, %v486_v29, %v1273_v35 }
  0xb2   : > { %v233_v38 = vor.u32 %v232_v32, %v231_v27  ;;  %v235_v40 = vshrl.u32 %v1116_v55, %v226_v7  ;;  %v227_v42 = vshrl.u32 %v1113_v49, %v226_v7  ;;  %v237_v44 = vshll.u32 %v1116_v55, %v1238_v45 }
  0xb3   : > { %v238_v48 = vshrl.u32 %v1117_v57, %v226_v7  ;;  %v241_v50 = vshrl.u32 %v1118_v2, %v226_v7  ;;  %v498_v52 = vmul.u32 %v1233_v41, %v482_v28  ;;  %v240_v56 = vshll.u32 %v1117_v57, %v1238_v45 }
  0xb4   : > { %v236_v54 = vor.u32 %v235_v40, %v234_v39  ;;  %vm243_vm6 = vcmp.lt.s32.totalorder %v1248_v59, 1  ;;  %vm500_vm7 = vc.u32 %v1270_v34, %v1273_v35  ;;  %v501_v58 = vadd.s32 1, %v1274_v36 }
  0xb5   : > { %v239_v61 = vor.u32 %v238_v48, %v237_v44  ;;  %vm244_vm8 = vcmp.lt.s32.totalorder %v1248_v59, 2  ;;  %v242_v62 = vor.u32 %v241_v50, %v240_v56  ;;  %vm245_vm9 = vcmp.lt.s32.totalorder %v1248_v59, 3 }
  0xb6   : > { %vm246_vm10 = vcmp.lt.s32.totalorder %v1248_v59, 4  ;;  %v251_v63 = vsel %vm243_vm6, %v230_v37, %v233_v38  ;;  %v502_v41 = vsel %vm500_vm7, %v501_v58, %v1274_v36  ;;  %v255_v45 = vsel %vm243_vm6, %v233_v38, %v236_v54  ;;  %v673_v36 = vpop.permute.xlu0 %672 }
  0xb7   : > { %v248_v0 = vsel %vm246_vm10, %v236_v54, 2102212464  ;;  %v252_v1 = vsel %vm246_vm10, %v239_v61, 920167782  ;;  %v503_v3 = vadd.s32 %v502_v41, %v498_v52  ;;  %v247_v4 = vsel %vm243_vm6, %v227_v42, %v230_v37 }
  0xb8   : > { %v253_v5 = vsel %vm245_vm9, %v236_v54, %v252_v1  ;;  %v256_v6 = vsel %vm246_vm10, %v242_v62, 1326507024  ;;  %v249_v7 = vsel %vm245_vm9, %v233_v38, %v248_v0  ;;  %v570_v10 = vadd.s32 1, %v1250_v60 }
  0xb9   : > { %v254_v8 = vsel %vm244_vm8, %v251_v63, %v253_v5  ;;  %v257_v9 = vsel %vm245_vm9, %v239_v61, %v256_v6  ;;  %v504_v13 = vadd.s32 536870912, %v503_v3  ;;  %v567_v23 = vand.u32 8388607, %v560_v47 }
  0xba   : > { %v258_v14 = vsel %vm244_vm8, %v255_v45, %v257_v9  ;;  %v1300_v15 = vmul.u32.u64.low %v1240_v46, %v254_v8  ;;  %v1301_v16 = vmul.u32.u64.high %v1240_v46, %v254_v8, %v1300_v15  ;;  %vm571_vm11 = vcmp.gt.s32.totalorder %v570_v10, 0 }
  0xbb   : > { %v1304_v19 = vmul.u32.u64.low %v1240_v46, %v258_v14  ;;  %v1305_v21 = vmul.u32.u64.high %v1240_v46, %v258_v14, %v1304_v19  ;;  %v505_v24 = vshrl.u32 %v504_v13, 30  ;;  %v250_v60 = vsel %vm244_vm8, %v247_v4, %v249_v7 }
  0xbc   : > { %v572_v25 = vsel %vm571_vm11, %v570_v10, 0  ;;  %v1313_v27 = vadd.f32 %v1210_v12, %v1236_v43  ;;  %v269_v29 = vadd.s32 1, %v1301_v16  ;;  %v266_v31 = vmul.u32 %v1240_v46, %v250_v60 }
  0xbd   : > { %v574_v26 = vand.u32 31, %v572_v25  ;;  %v506_v28 = vshll.u32 %v505_v24, 30  ;;  %vm268_vm12 = vc.u32 %v1305_v21, %v1300_v15  ;;  %v568_v32 = vor.u32 8388608, %v567_v23 }
  0xbe   : > { %v270_v59 = vsel %vm268_vm12, %v269_v29, %v1301_v16  ;;  %v331_v43 = vand.u32 2139095040, %v1313_v27  ;;  %v499_v39 = vadd.s32 %v1273_v35, %v1270_v34  ;;  %v328_v46 = vand.u32 2147483647, %v1313_v27 }
  0xbf   : > { %v575_v33 = vsub.s32 32, %v574_v26  ;;  %v1318_v37 = vsub.s32 %v503_v3, %v506_v28  ;;  %v271_v38 = vadd.s32 %v270_v59, %v266_v31  ;;  %v1327_v42 = vmul.f32 %v1205_v11, %v673_v36 }
  0xc0   : > { %v1329_v48 = vshrl.u32 %v572_v25, 5  ;;  %v1332_v52 = vshll.u32 %v568_v32, 8  ;;  %v529_v56 = vsub.s32 4, %v505_v24  ;;  %v577_v61 = vshll.u32 %v1113_v49, %v574_v26 }
  0xc1   : > { %v509_v40 = vsub.s32 0, %v1318_v37  ;;  %v272_v44 = vadd.s32 536870912, %v271_v38  ;;  %v578_v50 = vshrl.u32 %v1114_v51, %v575_v33  ;;  %v581_v58 = vshrl.u32 %v1115_v53, %v575_v33 }
  0xc2   : > { %v584_v34 = vshrl.u32 %v1116_v55, %v575_v33  ;;  %v587_v11 = vshrl.u32 %v1117_v57, %v575_v33  ;;  %v332_v62 = vshrl.u32 %v331_v43, 23  ;;  %v580_v41 = vshll.u32 %v1114_v51, %v574_v26 }
  0xc3   : > { %v906_v54 = vmin.u32 %v509_v40, %v1318_v37  ;;  %v273_v35 = vshrl.u32 %v272_v44, 30  ;;  %v583_v0 = vshll.u32 %v1115_v53, %v574_v26  ;;  %v590_v1 = vshrl.u32 %v1118_v2, %v575_v33 }
  0xc4   : > { %v1343_v45 = vadd.s32 %v1300_v15, %v1305_v21  ;;  %v579_v4 = vor.u32 %v578_v50, %v577_v61  ;;  %v586_v5 = vshll.u32 %v1116_v55, %v574_v26  ;;  %v582_v7 = vor.u32 %v581_v58, %v580_v41 }
  0xc5   : > { %v511_v63 = vclz %v906_v54  ;;  %v274_v3 = vshll.u32 %v273_v35, 30  ;;  %v585_v8 = vor.u32 %v584_v34, %v583_v0  ;;  %v589_v9 = vshll.u32 %v1117_v57, %v574_v26 }
  0xc6   : > { %v1349_v10 = vsel %vm445_vm13, %v529_v56, %v505_v24  ;;  %v576_v14 = vshrl.u32 %v1113_v49, %v575_v33  ;;  %v588_v15 = vor.u32 %v587_v11, %v586_v5  ;;  %v297_v19 = vsub.s32 4, %v273_v35 }
  0xc7   : > { %v907_v6 = vadd.s32 4294967294, %v511_v63  ;;  %v1352_v13 = vsub.s32 %v271_v38, %v274_v3  ;;  %v591_v21 = vor.u32 %v590_v1, %v589_v9  ;;  %vm592_vm1 = vcmp.lt.s32.totalorder %v1329_v48, 1 }
  0xc8   : > { %vm594_vm2 = vcmp.lt.s32.totalorder %v1329_v48, 3  ;;  %vm595_vm3 = vcmp.lt.s32.totalorder %v1329_v48, 4  ;;  %vm1367_vm4 = vcmp.le.f32.partialorder %v211_v22, 0.7853982  ;;  %v600_v28 = vsel %vm592_vm1, %v579_v4, %v582_v7 }
  0xc9   : > { %vm908_vm0 = vcmp.lt.s32.totalorder %v907_v6, 0  ;;  %v277_v24 = vsub.s32 0, %v1352_v13  ;;  %v597_v26 = vsel %vm595_vm3, %v585_v8, 2102212464  ;;  %v601_v32 = vsel %vm595_vm3, %v588_v15, 920167782 }
  0xca   : > { %v514_v23 = vsel %vm908_vm0, 0, %v907_v6  ;;  %v604_v33 = vsel %vm592_vm1, %v582_v7, %v585_v8  ;;  %v602_v22 = vsel %vm594_vm2, %v585_v8, %v601_v32  ;;  %v605_v38 = vsel %vm595_vm3, %v591_v21, 1326507024 }
  0xcb   : > { %v515_v60 = vsub.s32 32, %v514_v23  ;;  %v519_v25 = vsub.s32 4294967266, %v514_v23  ;;  %v516_v29 = vshll.u32 %v1318_v37, %v514_v23  ;;  %v895_v31 = vmin.u32 %v277_v24, %v1352_v13 }
  0xcc   : > { %vm593_vm5 = vcmp.lt.s32.totalorder %v1329_v48, 2  ;;  %v596_v40 = vsel %vm592_vm1, %v576_v14, %v579_v4  ;;  %v598_v37 = vsel %vm594_vm2, %v582_v7, %v597_v26  ;;  %v298_v63 = vsel %vm213_vm14, %v297_v19, %v273_v35 }
  0xcd   : > { %v517_v36 = vshrl.u32 %v499_v39, %v515_v60  ;;  %v520_v59 = vadd.s32 127, %v519_v25  ;;  %v279_v43 = vclz %v895_v31  ;;  %v603_v54 = vsel %vm593_vm5, %v600_v28, %v602_v22 }
  0xce   : > { %v606_v39 = vsel %vm594_vm2, %v588_v15, %v605_v38  ;;  %v1387_v34 = vmul.u32.u64.low %v1332_v52, %v603_v54  ;;  %v1388_v61 = vmul.u32.u64.high %v1332_v52, %v603_v54, %v1387_v34  ;;  %v532_v1 = vsel %vm1357_vm15, 0, %v1349_v10 }
  0xcf   : > { %v518_v44 = vor.u32 %v517_v36, %v516_v29  ;;  %v521_v50 = vshll.u32 %v520_v59, 23  ;;  %v896_v56 = vadd.s32 4294967294, %v279_v43  ;;  %v607_v58 = vsel %vm593_vm5, %v604_v33, %v606_v39 }
  0xd0   : > { %v1393_v41 = vmul.u32.u64.low %v1332_v52, %v607_v58  ;;  %v1394_v0 = vmul.u32.u64.high %v1332_v52, %v607_v58, %v1393_v41  ;;  %v599_v48 = vsel %vm593_vm5, %v596_v40, %v598_v37  ;;  %v899_v3 = vadd.s32 4294967169, %v332_v62 }
  0xd1   : > { %v522_v11 = vor.u32 4788187, %v521_v50  ;;  %vm897_vm6 = vcmp.lt.s32.totalorder %v896_v56, 0  ;;  %v525_v5 = vcvt.s32.f32 %v518_v44  ;;  %v1401_v7 = vadd.f32 %v1210_v12, %v1327_v42 }
  0xd2   : > { %v282_v6 = vsel %vm897_vm6, 0, %v896_v56  ;;  %v300_v9 = vsel %vm1367_vm4, 0, %v298_v63  ;;  %v618_v14 = vadd.s32 1, %v1388_v61  ;;  %v615_v10 = vmul.u32 %v1332_v52, %v599_v48 }
  0xd3   : > { %v523_v4 = vand.u32 2147483647, %v522_v11  ;;  %v283_v8 = vsub.s32 32, %v282_v6  ;;  %v287_v35 = vsub.s32 4294967266, %v282_v6  ;;  %vm617_vm7 = vc.u32 %v1394_v0, %v1387_v34 }
  0xd4   : > { %v338_v62 = vadd.s32 1, %v899_v3  ;;  %v284_v19 = vshll.u32 %v1352_v13, %v282_v6  ;;  %v619_v12 = vsel %vm617_vm7, %v618_v14, %v1388_v61  ;;  %v335_v60 = vand.u32 8388607, %v328_v46 }
  0xd5   : > { %v526_v15 = vmul.f32 %v525_v5, %v523_v4  ;;  %v285_v21 = vshrl.u32 %v1343_v45, %v283_v8  ;;  %v288_v23 = vadd.s32 127, %v287_v35  ;;  %v620_v24 = vadd.s32 %v619_v12, %v615_v10 }
  0xd6   : > { %vm339_vm8 = vcmp.gt.s32.totalorder %v338_v62, 0  ;;  %v536_v25 = vadd.s32 3, %v532_v1  ;;  %v304_v31 = vadd.s32 3, %v300_v9  ;;  %v336_v43 = vor.u32 8388608, %v335_v60 }
  0xd7   : > { %v527_v42 = vxor.u32 2147483648, %v526_v15  ;;  %v286_v26 = vor.u32 %v285_v21, %v284_v19  ;;  %v289_v28 = vshll.u32 %v288_v23, 23  ;;  %v340_v52 = vsel %vm339_vm8, %v338_v62, 0 }
  0xd8   : > { %v621_v13 = vadd.s32 536870912, %v620_v24  ;;  %v342_v32 = vand.u32 31, %v340_v52  ;;  %v1420_v40 = vand.u32 3, %v536_v25  ;;  %v1422_v37 = vand.u32 3, %v304_v31 }
  0xd9   : > { %v528_v29 = vsel %vm445_vm13, %v527_v42, %v526_v15  ;;  %v290_v33 = vor.u32 4788187, %v289_v28  ;;  %v293_v38 = vcvt.s32.f32 %v286_v26  ;;  %v1426_v54 = vadd.s32 %v1387_v34, %v1394_v0 }
  0xda   : > { %v531_v45 = vsel %vm1357_vm15, %v1215_v17, %v528_v29  ;;  %v1418_v36 = vshrl.u32 %v621_v13, 30  ;;  %v343_v59 = vsub.s32 32, %v342_v32  ;;  %v351_v16 = vshll.u32 %v1115_v53, %v342_v32 }
  0xdb   : > { %1014 = vcosq.f32 %v531_v45  ;;  %v291_v22 = vand.u32 2147483647, %v290_v33  ;;  %v1435_v41 = vshrl.u32 %v340_v52, 5  ;;  %v354_v1 = vshll.u32 %v1116_v55, %v342_v32 }
  0xdc   : > { %1016 = vsinq.f32 %v531_v45  ;;  %v623_v44 = vshll.u32 %v1418_v36, 30  ;;  %v352_v39 = vshrl.u32 %v1116_v55, %v343_v59  ;;  %v346_v58 = vshrl.u32 %v1114_v51, %v343_v59 }
  0xdd   : > { %v294_v50 = vmul.f32 %v293_v38, %v291_v22  ;;  %v349_v61 = vshrl.u32 %v1115_v53, %v343_v59  ;;  %v355_v11 = vshrl.u32 %v1117_v57, %v343_v59  ;;  %v1438_v48 = vshll.u32 %v336_v43, 8 }
  0xde   : > { %v1430_v56 = vsub.s32 %v620_v24, %v623_v44  ;;  %v345_v0 = vshll.u32 %v1113_v49, %v342_v32  ;;  %v348_v3 = vshll.u32 %v1114_v51, %v342_v32  ;;  %v353_v4 = vor.u32 %v352_v39, %v351_v16 }
  0xdf   : > { %v295_v63 = vxor.u32 2147483648, %v294_v50  ;;  %vm542_vm9 = vcmp.eq.s32.totalorder %v1420_v40, 2  ;;  %v356_v6 = vor.u32 %v355_v11, %v354_v1  ;;  %v357_v8 = vshll.u32 %v1117_v57, %v342_v32 }
  0xe0   : > { %v626_v34 = vsub.s32 0, %v1430_v56  ;;  %v358_v35 = vshrl.u32 %v1118_v2, %v343_v59  ;;  %vm539_vm10 = vcmp.eq.s32.totalorder %v1420_v40, 0  ;;  %v347_v15 = vor.u32 %v346_v58, %v345_v0 }
  0xe1   : > { %v296_v5 = vsel %vm213_vm14, %v295_v63, %v294_v50  ;;  %v350_v10 = vor.u32 %v349_v61, %v348_v3  ;;  %vm315_vm11 = vcmask 261120   ;;  %vm538_vm12 = vcmp.lt.s32.totalorder %v1420_v40, 2 }
  0xe2   : > { %v299_v9 = vsel %vm1367_vm4, %v1218_v18, %v296_v5  ;;  %v912_v14 = vmin.u32 %v626_v34, %v1430_v56  ;;  %v646_v62 = vsub.s32 4, %v1418_v36  ;;  %v359_v19 = vor.u32 %v358_v35, %v357_v8 }
  0xe3   : > { %1018 = vcosq.f32 %v299_v9  ;;  %v677_v21 = vand.u32 2147483647, %v1401_v7  ;;  %vm535_vm13 = vweird.f32 %v1215_v17  ;;  %v344_v23 = vshrl.u32 %v1113_v49, %v343_v59 }
  0xe4   : > { %1020 = vsinq.f32 %v299_v9  ;;  %v628_v20 = vclz %v912_v14  ;;  %vm363_vm14 = vcmp.lt.s32.totalorder %v1435_v41, 4  ;;  %vm360_vm15 = vcmp.lt.s32.totalorder %v1435_v41, 1 }
  0xe5   : > { %vm361_vm0 = vcmp.lt.s32.totalorder %v1435_v41, 2  ;;  %v365_v12 = vsel %vm363_vm14, %v353_v4, 2102212464  ;;  %v369_v42 = vsel %vm363_vm14, %v356_v6, 920167782  ;;  %vm562_vm1 = vcmp.lt.s32.totalorder %v1230_v30, 0 }
  0xe6   : > { %v913_v24 = vadd.s32 4294967294, %v628_v20  ;;  %vm362_vm2 = vcmp.lt.s32.totalorder %v1435_v41, 3  ;;  %v364_v60 = vsel %vm360_vm15, %v344_v23, %v347_v15  ;;  %v372_v25 = vsel %vm360_vm15, %v350_v10, %v353_v4 }
  0xe7   : > { %v368_v28 = vsel %vm360_vm15, %v347_v15, %v350_v10  ;;  %v370_v52 = vsel %vm362_vm2, %v353_v4, %v369_v42  ;;  %v373_v29 = vsel %vm363_vm14, %v359_v19, 1326507024  ;;  %v680_v31 = vand.u32 2139095040, %v1401_v7 }
  0xe8   : > { %v1015_v26 = vpop.eup %1014  ;;  %vm914_vm3 = vcmp.lt.s32.totalorder %v913_v24, 0  ;;  %v366_v45 = vsel %vm362_vm2, %v350_v10, %v365_v12  ;;  %v374_v33 = vsel %vm362_vm2, %v356_v6, %v373_v29  ;;  %v371_v39 = vsel %vm361_vm0, %v368_v28, %v370_v52 }
  0xe9   : > { %v1017_v13 = vpop.eup %1016  ;;  %v543_v32 = vxor.u32 2147483648, %v1015_v26  ;;  %v631_v22 = vsel %vm914_vm3, 0, %v913_v24  ;;  %v375_v38 = vsel %vm361_vm0, %v372_v25, %v374_v33  ;;  %v681_v43 = vshrl.u32 %v680_v31, 23 }
  0xea   : > { %v540_v59 = vxor.u32 2147483648, %v1017_v13  ;;  %v632_v50 = vsub.s32 32, %v631_v22  ;;  %v636_v16 = vsub.s32 4294967266, %v631_v22  ;;  %v633_v34 = vshll.u32 %v1430_v56, %v631_v22 }
  0xeb   : > { %v544_v44 = vsel %vm542_vm9, %v543_v32, %v1017_v13  ;;  %v1476_v61 = vmul.u32.u64.low %v1438_v48, %v375_v38  ;;  %v1477_v11 = vmul.u32.u64.high %v1438_v48, %v375_v38, %v1476_v61  ;;  %v917_v63 = vadd.s32 4294967169, %v681_v43 }
  0xec   : > { %v541_v58 = vsel %vm539_vm10, %v1015_v26, %v540_v59  ;;  %v634_v0 = vshrl.u32 %v1426_v54, %v632_v50  ;;  %v637_v3 = vadd.s32 127, %v636_v16  ;;  %vm303_vm4 = vweird.f32 %v1218_v18 }
  0xed   : > { %v545_v1 = vsel %vm538_vm12, %v541_v58, %v544_v44  ;;  %v1487_v5 = vmul.u32.u64.low %v1438_v48, %v371_v39  ;;  %v1488_v6 = vmul.u32.u64.high %v1438_v48, %v371_v39, %v1487_v5  ;;  %v687_v8 = vadd.s32 1, %v917_v63 }
  0xee   : > { %v546_v4 = vsel %vm535_vm13, nan, %v545_v1  ;;  %vm306_vm5 = vcmp.lt.s32.totalorder %v1422_v37, 2  ;;  %vm1498_vm6 = vcmp.le.f32.partialorder %v560_v47, 0.7853982  ;;  %v635_v40 = vor.u32 %v634_v0, %v633_v34 }
  0xef   : > { %909 = vst.msk [vmem:[%s1491_s10 + $0x10] sm:$0xff] %vm315_vm11, %v546_v4  ;;  %v638_v54 = vshll.u32 %v637_v3, 23  ;;  %vm307_vm7 = vcmp.eq.s32.totalorder %v1422_v37, 0  ;;  %v647_v56 = vsel %vm562_vm1, %v646_v62, %v1418_v36  ;;  %v367_v35 = vsel %vm361_vm0, %v364_v60, %v366_v45 }
  0xf0   : > { %vm688_vm8 = vcmp.gt.s32.totalorder %v687_v8, 0  ;;  %v1019_v9 = vpop.eup %1018  ;;  %vm385_vm9 = vc.u32 %v1477_v11, %v1487_v5  ;;  %v684_v47 = vand.u32 8388607, %v677_v21  ;;  %vm310_vm10 = vcmp.eq.s32.totalorder %v1422_v37, 2 }
  0xf1   : > { %v639_v14 = vor.u32 4788187, %v638_v54  ;;  %v689_v15 = vsel %vm688_vm8, %v687_v8, 0  ;;  %v1021_v10 = vpop.eup %1020  ;;  %v311_v19 = vxor.u32 2147483648, %v1019_v9  ;;  %v386_v20 = vadd.s32 1, %v1488_v6 }
  0xf2   : > { %v691_v36 = vand.u32 31, %v689_v15  ;;  %v308_v62 = vxor.u32 2147483648, %v1021_v10  ;;  %v642_v23 = vcvt.s32.f32 %v635_v40  ;;  %v383_v12 = vmul.u32 %v1438_v48, %v367_v35 }
  0xf3   : > { %v640_v41 = vand.u32 2147483647, %v639_v14  ;;  %v312_v42 = vsel %vm310_vm10, %v311_v19, %v1021_v10  ;;  %v649_v24 = vsel %vm1498_vm6, 0, %v647_v56  ;;  %v387_v60 = vsel %vm385_vm9, %v386_v20, %v1488_v6 }
  0xf4   : > { %v692_v25 = vsub.s32 32, %v691_v36  ;;  %v309_v26 = vsel %vm307_vm7, %v1019_v9, %v308_v62  ;;  %v388_v52 = vadd.s32 %v387_v60, %v383_v12  ;;  %v685_v29 = vor.u32 8388608, %v684_v47 }
  0xf5   : > { %v643_v28 = vmul.f32 %v642_v23, %v640_v41  ;;  %v313_v31 = vsel %vm306_vm5, %v309_v26, %v312_v42  ;;  %v694_v13 = vshll.u32 %v1113_v49, %v691_v36  ;;  %v690_v22 = vshrl.u32 %v689_v15, 5 }
  0xf6   : > { %v695_v48 = vshrl.u32 %v1114_v51, %v692_v25  ;;  %v698_v32 = vshrl.u32 %v1115_v53, %v692_v25  ;;  %v314_v45 = vsel %vm303_vm4, nan, %v313_v31  ;;  %v389_v59 = vadd.s32 536870912, %v388_v52 }
  0xf7   : > { %v644_v33 = vxor.u32 2147483648, %v643_v28  ;;  %316 = vst.msk [vmem:[%s1491_s10] sm:$0xff] %vm315_vm11, %v314_v45  ;;  %v697_v43 = vshll.u32 %v1114_v51, %v691_v36  ;;  %v700_v37 = vshll.u32 %v1115_v53, %v691_v36  ;;  %v701_v44 = vshrl.u32 %v1116_v55, %v692_v25 }
  0xf8   : > { %v696_v38 = vor.u32 %v695_v48, %v694_v13  ;;  %v1534_v16 = vshrl.u32 %v389_v59, 30  ;;  %v703_v18 = vshll.u32 %v1116_v55, %v691_v36  ;;  %v704_v39 = vshrl.u32 %v1117_v57, %v692_v25 }
  0xf9   : > { %v645_v50 = vsel %vm562_vm1, %v644_v33, %v643_v28  ;;  %v699_v61 = vor.u32 %v698_v32, %v697_v43  ;;  %v706_v51 = vshll.u32 %v1117_v57, %v691_v36  ;;  %v707_v53 = vshrl.u32 %v1118_v2, %v692_v25 }
  0xfa   : > { %v648_v58 = vsel %vm1498_vm6, %v1230_v30, %v645_v50  ;;  %v391_v63 = vshll.u32 %v1534_v16, 30  ;;  %v702_v1 = vor.u32 %v701_v44, %v700_v37  ;;  %v705_v34 = vor.u32 %v704_v39, %v703_v18 }
  0xfb   : > { %1022 = vcosq.f32 %v648_v58  ;;  %v708_v0 = vor.u32 %v707_v53, %v706_v51  ;;  %vm709_vm12 = vcmp.lt.s32.totalorder %v690_v22, 1  ;;  %vm712_vm13 = vcmp.lt.s32.totalorder %v690_v22, 4 }
  0xfc   : > { %1024 = vsinq.f32 %v648_v58  ;;  %v392_v3 = vsub.s32 %v388_v52, %v391_v63  ;;  %v653_v55 = vadd.s32 3, %v649_v24  ;;  %vm711_vm14 = vcmp.lt.s32.totalorder %v690_v22, 3 }
  0xfd   : > { %v717_v4 = vsel %vm709_vm12, %v696_v38, %v699_v61  ;;  %v718_v6 = vsel %vm712_vm13, %v705_v34, 920167782  ;;  %vm710_vm15 = vcmp.lt.s32.totalorder %v690_v22, 2  ;;  %v725_v2 = vshll.u32 %v685_v29, 8 }
  0xfe   : > { %v394_v8 = vsub.s32 0, %v392_v3  ;;  %v719_v57 = vsel %vm711_vm14, %v702_v1, %v718_v6  ;;  %v714_v17 = vsel %vm712_vm13, %v702_v1, 2102212464  ;;  %v721_v54 = vsel %vm709_vm12, %v699_v61, %v702_v1 }
  0xff   : > { %v720_v40 = vsel %vm710_vm15, %v717_v4, %v719_v57  ;;  %v722_v56 = vsel %vm712_vm13, %v708_v0, 1326507024  ;;  %v693_v9 = vshrl.u32 %v1113_v49, %v692_v25  ;;  %v715_v36 = vsel %vm711_vm14, %v699_v61, %v714_v17 }
 0x100   : > { %v900_v35 = vmin.u32 %v394_v8, %v392_v3  ;;  %v723_v14 = vsel %vm711_vm14, %v705_v34, %v722_v56  ;;  %v1551_v15 = vmul.u32.u64.low %v725_v2, %v720_v40  ;;  %v1552_v10 = vmul.u32.u64.high %v725_v2, %v720_v40, %v1551_v15 }
 0x101   : > { %v724_v47 = vsel %vm710_vm15, %v721_v54, %v723_v14  ;;  %v713_v20 = vsel %vm709_vm12, %v693_v9, %v696_v38  ;;  %v654_v62 = vand.u32 3, %v653_v55  ;;  %v384_v60 = vadd.s32 %v1487_v5, %v1477_v11 }
 0x102   : > { %v396_v19 = vclz %v900_v35  ;;  %v1556_v41 = vmul.u32.u64.low %v725_v2, %v724_v47  ;;  %v1557_v23 = vmul.u32.u64.high %v725_v2, %v724_v47, %v1556_v41  ;;  %v716_v42 = vsel %vm710_vm15, %v713_v20, %v715_v36 }
 0x103   : > { %v735_v49 = vadd.s32 1, %v1552_v10  ;;  %vm656_vm1 = vcmp.eq.s32.totalorder %v654_v62, 0  ;;  %v732_v31 = vmul.u32 %v725_v2, %v716_v42  ;;  %vm659_vm3 = vcmp.eq.s32.totalorder %v654_v62, 2 }
 0x104   : > { %v901_v12 = vadd.s32 4294967294, %v396_v19  ;;  %vm734_vm2 = vc.u32 %v1557_v23, %v1551_v15  ;;  %vm652_vm4 = vweird.f32 %v1230_v30  ;;  %vm655_vm5 = vcmp.lt.s32.totalorder %v654_v62, 2 }
 0x105   : > { %v736_v32 = vsel %vm734_vm2, %v735_v49, %v1552_v10  ;;  %vm330_vm6 = vcmp.lt.s32.totalorder %v1313_v27, 0  ;;  %v414_v30 = vsub.s32 4, %v1534_v16  ;;  %vm329_vm7 = vcmp.le.f32.partialorder %v328_v46, 0.7853982 }
 0x106   : > { %vm902_vm0 = vcmp.lt.s32.totalorder %v901_v12, 0  ;;  %v737_v22 = vadd.s32 %v736_v32, %v732_v31  ;;  %v733_v2 = vadd.s32 %v1551_v15, %v1557_v23  ;;  %vm420_vm13 = vweird.f32 %v1313_v27 }
 0x107   : > { %v399_v25 = vsel %vm902_vm0, 0, %v901_v12  ;;  %v415_v4 = vsel %vm330_vm6, %v414_v30, %v1534_v16  ;;  %vm679_vm14 = vcmp.lt.s32.totalorder %v1401_v7, 0  ;;  %vm678_vm15 = vcmp.le.f32.partialorder %v677_v21, 0.7853982 }
 0x108   : > { %v1023_v24 = vpop.eup %1022  ;;  %v400_v52 = vsub.s32 32, %v399_v25  ;;  %v404_v29 = vsub.s32 4294967266, %v399_v25  ;;  %v401_v48 = vshll.u32 %v392_v3, %v399_v25  ;;  %v738_v37 = vadd.s32 536870912, %v737_v22 }
 0x109   : > { %v1025_v26 = vpop.eup %1024  ;;  %v660_v28 = vxor.u32 2147483648, %v1023_v24  ;;  %v417_v8 = vsel %vm329_vm7, 0, %v415_v4 }
 0x10a   : > { %v657_v13 = vxor.u32 2147483648, %v1025_v26  ;;  %v402_v33 = vshrl.u32 %v384_v60, %v400_v52  ;;  %v405_v59 = vadd.s32 127, %v404_v29  ;;  %v739_v18 = vshrl.u32 %v738_v37, 30 }
 0x10b   : > { %v661_v45 = vsel %vm659_vm3, %v660_v28, %v1025_v26  ;;  %v421_v54 = vadd.s32 3, %v417_v8  ;;  %vm769_vm3 = vweird.f32 %v1401_v7 }
 0x10c   : > { %v658_v11 = vsel %vm656_vm1, %v1023_v24, %v657_v13  ;;  %v403_v38 = vor.u32 %v402_v33, %v401_v48  ;;  %v406_v43 = vshll.u32 %v405_v59, 23  ;;  %v740_v61 = vshll.u32 %v739_v18, 30 }
 0x10d   : > { %v662_v5 = vsel %vm655_vm5, %v658_v11, %v661_v45  ;;  %v422_v47 = vand.u32 3, %v421_v54  ;;  %v763_v60 = vsub.s32 4, %v739_v18 }
 0x10e   : > { %v663_v44 = vsel %vm652_vm4, nan, %v662_v5  ;;  %v407_v50 = vor.u32 4788187, %v406_v43  ;;  %v410_v58 = vcvt.s32.f32 %v403_v38  ;;  %v741_v53 = vsub.s32 %v737_v22, %v740_v61 }
 0x10f   : > { %915 = vst.msk [vmem:[%s1491_s10 + $0x18] sm:$0xff] %vm315_vm11, %v663_v44  ;;  %vm427_vm9 = vcmp.eq.s32.totalorder %v422_v47, 2  ;;  %vm424_vm10 = vcmp.eq.s32.totalorder %v422_v47, 0  ;;  %vm423_vm12 = vcmp.lt.s32.totalorder %v422_v47, 2  ;;  %v764_v28 = vsel %vm679_vm14, %v763_v60, %v739_v18 }
 0x110   : > { %v408_v39 = vand.u32 2147483647, %v407_v50  ;;  %v743_v1 = vsub.s32 0, %v741_v53 }
 0x112   : > { %v411_v51 = vmul.f32 %v410_v58, %v408_v39  ;;  %v918_v0 = vmin.u32 %v743_v1, %v741_v53 }
 0x114   : > { %v412_v63 = vxor.u32 2147483648, %v411_v51  ;;  %v745_v55 = vclz %v918_v0 }
 0x116   : > { %v413_v34 = vsel %vm330_vm6, %v412_v63, %v411_v51  ;;  %v919_v6 = vadd.s32 4294967294, %v745_v55 }
 0x117   : > { %v416_v3 = vsel %vm329_vm7, %v1313_v27, %v413_v34  ;;  %v766_v27 = vsel %vm678_vm15, 0, %v764_v28 }
 0x118   : > { %1026 = vcosq.f32 %v416_v3  ;;  %vm920_vm8 = vcmp.lt.s32.totalorder %v919_v6, 0  ;;  %v770_v52 = vadd.s32 3, %v766_v27 }
 0x119   : > { %1028 = vsinq.f32 %v416_v3  ;;  %v748_v57 = vsel %vm920_vm8, 0, %v919_v6 }
 0x11a   : > { %v749_v17 = vsub.s32 32, %v748_v57  ;;  %v753_v40 = vsub.s32 4294967266, %v748_v57  ;;  %v750_v56 = vshll.u32 %v741_v53, %v748_v57  ;;  %v771_v29 = vand.u32 3, %v770_v52 }
 0x11c   : > { %v751_v46 = vshrl.u32 %v733_v2, %v749_v17  ;;  %v754_v35 = vadd.s32 127, %v753_v40  ;;  %vm776_vm0 = vcmp.eq.s32.totalorder %v771_v29, 2  ;;  %vm773_vm1 = vcmp.eq.s32.totalorder %v771_v29, 0 }
 0x11d   : > { %vm772_vm2 = vcmp.lt.s32.totalorder %v771_v29, 2 }
 0x11e   : > { %v752_v9 = vor.u32 %v751_v46, %v750_v56  ;;  %v755_v14 = vshll.u32 %v754_v35, 23 }
 0x120   : > { %v756_v10 = vor.u32 4788187, %v755_v14  ;;  %v759_v62 = vcvt.s32.f32 %v752_v9 }
 0x122   : > { %v757_v36 = vand.u32 2147483647, %v756_v10 }
 0x124   : > { %v760_v23 = vmul.f32 %v759_v62, %v757_v36 }
 0x125   : > { %v1027_v19 = vpop.eup %1026 }
 0x126   : > { %v1029_v20 = vpop.eup %1028  ;;  %v428_v16 = vxor.u32 2147483648, %v1027_v19  ;;  %v761_v49 = vxor.u32 2147483648, %v760_v23 }
 0x127   : > { %v425_v41 = vxor.u32 2147483648, %v1029_v20 }
 0x128   : > { %v429_v15 = vsel %vm427_vm9, %v428_v16, %v1029_v20  ;;  %v762_v25 = vsel %vm679_vm14, %v761_v49, %v760_v23 }
 0x129   : > { %v426_v12 = vsel %vm424_vm10, %v1027_v19, %v425_v41  ;;  %v765_v26 = vsel %vm678_vm15, %v1401_v7, %v762_v25 }
 0x12a   : > { %v430_v42 = vsel %vm423_vm12, %v426_v12, %v429_v15  ;;  %1030 = vcosq.f32 %v765_v26 }
 0x12b   : > { %v431_v24 = vsel %vm420_vm13, nan, %v430_v42  ;;  %1032 = vsinq.f32 %v765_v26 }
 0x12c   : > { %903 = vst.msk [vmem:[%s1491_s10 + $0x8] sm:$0xff] %vm315_vm11, %v431_v24 }
 0x137   : > { %v1031_v31 = vpop.eup %1030 }
 0x138   : > { %v1033_v13 = vpop.eup %1032  ;;  %v777_v48 = vxor.u32 2147483648, %v1031_v31 }
 0x139   : > { %v774_v32 = vxor.u32 2147483648, %v1033_v13 }
 0x13a   : > { %v778_v21 = vsel %vm776_vm0, %v777_v48, %v1033_v13 }
 0x13b   : > { %v775_v45 = vsel %vm773_vm1, %v1031_v31, %v774_v32 }
 0x13c   : > { %v779_v33 = vsel %vm772_vm2, %v775_v45, %v778_v21 }
 0x13d   : > { %v780_v59 = vsel %vm769_vm3, nan, %v779_v33 }
 0x13e   : > { %921 = vst.msk [vmem:[%s1491_s10 + $0x20] sm:$0xff] %vm315_vm11, %v780_v59 }
 0x13f   : > { %1047 = shalt.err (!%p1044_p5)
}
 0x140   : > { %s1048_s30 = scalar_lea.hbm %s1588_s23, 640  ;;  %s1052_s6 = scalar_lea.hbm %s1645_s3, 1280 }
 0x141   : > { %p1049_p6 = scmp.ne.s32.totalorder %s1588_s23, %s1048_s30  ;;  %p1053_p10 = scmp.lt.s32.totalorder %s1588_s23, %s1645_s3 }
 0x142   : > { %p1054_p11 = scmp.lt.s32.totalorder %s1052_s6, %s1048_s30 }
 0x143   : > { %p1050_p7 = pnand %p1049_p6, %p1182_p4 }
 0x144   : > { %p1055_p12 = por %p1054_p11, %p1053_p10 }
 0x145   : > { %p1051_p9 = pneg %p1050_p7 }
 0x147   : > { %p1056_p13 = pnand %p1055_p12, %p1051_p9 }
 0x149   : > { %1059 = shalt.err (!%p1056_p13)
}
 0x14a   : > { %s1120_s9 = smov 128   ;;  %s1121_s10 = smov 8  }
 0x14b   : > { %948 = dma.vmem_to_hbm [thread:$0]  (%p1182_p4), %s1590_s18, 640, %s1588_s23, %s1597_s15, %s1120_s9, %s1120_s9, %s1121_s10  }
 0x14c PF: > { %p954_p0 = scmp.ge.s32.totalorder %s1110_s17, 2  ;;  %s813_s11 = sand.u32 1, %s1090_s12  }
 0x14d   : > { %s814_s19 = scalar_lea.sflag [#allocation3], %s813_s11 }
 0x14e   : > { %p951_p1 = pnand %p954_p0, %p1189_p8 }
 0x150   : > { %p952_p2 = pneg %p951_p1 }
 0x152   : > { %1085 = dma.done.wait (%p952_p2), %s814_s19, 640  }
 0x153   : > { %1087 = vsyncadd (%p952_p2), %s814_s19, 4294966656  ;;  %s16_s17 = sadd.s32 1, %s1110_s17   ;;  %s1654_s12 = smov %s1094_s13 }
 0x154   : > { %p13_p3 = scmp.ge.s32.totalorder %s16_s17, 4   ;;  %s1655_s13 = smov %s1098_s14 }
 0x155   : > { %s1656_s14 = smov %s1195_s25  ;;  %s1657_s15 = smov %s1106_s16 }
 0x156   : > { %s1658_s16 = smov %s1660_s20  ;;  %15 = sbr.rel (!%p13_p3) target bundleno = 4 (0x4), region = 76 }
 0x15b   :  { %819 = vsyncpa [#allocation3], 1 }
 0x15c   :  { %821 = vsyncpa [#allocation3 + $0x1], 1 }

</bundles_post_ra>
